<compile_context>
chip_gen: v7x
topology: tpu7x:2x2x1
jax: 0.10.0
libtpu: 0.0.40
codegen_flags: <defaults>
</compile_context>

<pallas_src>
import jax
import jax.numpy as jnp
from jax.experimental import pallas as pl
from jax.experimental.pallas import tpu as pltpu

NUM_CLASSES = 16
HIDDEN = 128          # conv1: 128 -> 128
BN_EPS = 1e-5


def _round_up(x, m):
    return (x + m - 1) // m * m


def seg_head_kernel(x_ref, w1_ref, b1_ref, w2_ref, b2_ref, out_ref):
    """One (batch, point-tile) step: conv1 + bn + relu + conv2 + log_softmax (NCW)."""
    # x_ref: (1, C, tn) activations; channels on sublanes, points on lanes.
    x = x_ref[0].astype(jnp.bfloat16)                                   # (C, tn)

    # conv1 (1x1 Conv1d) with BatchNorm folded in, then ReLU.
    # bf16 MXU matmul, f32 accumulation; bias/ReLU stay f32 (no bf16 VPU on v5e).
    h = jnp.dot(w1_ref[...], x, preferred_element_type=jnp.float32)     # (C, tn)
    h = jnp.maximum(h + b1_ref[...], 0.0)

    # drop1: nn.Dropout(0.5) is identity at inference.
    # TODO(synk): no PRNG/dropout path if training parity is ever required.

    # conv2 (1x1 Conv1d): 128 -> num_classes, kept dense (no lane padding).
    logits = jnp.dot(w2_ref[...], h.astype(jnp.bfloat16),
                     preferred_element_type=jnp.float32) + b2_ref[...]  # (nc, tn)

    # log_softmax over the class (sublane) axis — 16 rows, cheap XLU reduce,
    # 8x fewer exp/log than the previously 128-padded version.
    m = jnp.max(logits, axis=0, keepdims=True)
    lse = jnp.log(jnp.sum(jnp.exp(logits - m), axis=0, keepdims=True)) + m
    out_ref[0] = (logits - lse).astype(out_ref.dtype)


def prepare_head_params(params):
    """Fold BN into conv1 and cast the matmul weights to bf16 (channel-major)."""
    w1, b1, gamma, beta, mean, var, w2, b2 = params
    scale = gamma * jax.lax.rsqrt(var + BN_EPS)                      # (C,)
    w1f = (w1 * scale[:, None]).astype(jnp.bfloat16)                 # (C, C)
    b1f = ((b1 - mean) * scale + beta).astype(jnp.float32).reshape(-1, 1)   # (C, 1)
    w2b = w2.astype(jnp.bfloat16)                                    # (nc, C)
    b2c = b2.astype(jnp.float32).reshape(-1, 1)                      # (nc, 1)
    return w1f, b1f, w2b, b2c


def _choose_point_tile(B, N, tn_max=2048, tn_min=256, min_steps=4):
    """Lane-tile over points: big for bandwidth, small enough for >=4 grid steps."""
    tn = min(tn_max, _round_up(N, 128))
    tn = max(128, tn - tn % 128)
    while tn > tn_min and B * ((N + tn - 1) // tn) < min_steps:
        tn = max(tn_min, (tn // 2) // 128 * 128)
    return tn


def seg_head(l0_points, prepared, *, tn=None):
    """l0_points: (B, C, N) NCW activations (fp1 output) -> (B, N, nclass) log-probs."""
    w1f, b1f, w2b, b2c = prepared
    B, C, N = l0_points.shape
    nc = w2b.shape[0]

    tn = _choose_point_tile(B, N) if tn is None else tn
    grid = (B, pl.cdiv(N, tn))

    # Advisory cost hint for XLA scheduling around the custom call.
    flops = 2 * B * N * C * (C + nc)
    bytes_accessed = (B * C * N * l0_points.dtype.itemsize    # activation read
                      + B * nc * N * 4                        # log-prob write
                      + w1f.size * 2 + w2b.size * 2
                      + b1f.size * 4 + b2c.size * 4)
    cost = pl.CostEstimate(flops=int(flops),
                           transcendentals=int(B * N * nc),
                           bytes_accessed=int(bytes_accessed))

    const = lambda b, j: (0, 0)   # weights / biases fully resident in VMEM
    out_ncw = pl.pallas_call(
        seg_head_kernel,
        out_shape=jax.ShapeDtypeStruct((B, nc, N), jnp.float32),
        grid_spec=pltpu.PrefetchScalarGridSpec(
            num_scalar_prefetch=0,
            grid=grid,
            in_specs=[
                pl.BlockSpec((1, C, tn), lambda b, j: (b, 0, j)),   # x tile (NCW)
                pl.BlockSpec((C, C), const),                        # folded W1 (bf16)
                pl.BlockSpec((C, 1), const),                        # folded b1 (f32)
                pl.BlockSpec((nc, C), const),                       # W2 (bf16)
                pl.BlockSpec((nc, 1), const),                       # b2 (f32)
            ],
            out_specs=pl.BlockSpec((1, nc, tn), lambda b, j: (b, 0, j)),
        ),
        compiler_params=pltpu.CompilerParams(
            dimension_semantics=("parallel", "parallel")),
        cost_estimate=cost,
    )(l0_points, w1f, b1f, w2b, b2c)

    # Final permute to match log_softmax(conv2(...), dim=1).permute(0, 2, 1).
    # TODO(synk): fold this permute into the kernel store (in-kernel (nc,tn)->(tn,nc)
    # transpose) or drop it if the consumer accepts channel-major log-probs.
    return jnp.transpose(out_ncw, (0, 2, 1))


def reference_head(l0_points, prepared):
    """Plain-JAX reference using the exact same folded / bf16-cast parameters."""
    w1f, b1f, w2b, b2c = prepared
    x = l0_points.astype(jnp.bfloat16).astype(jnp.float32)                  # (B, C, N)
    h = jnp.einsum('oc,bcn->bon', w1f.astype(jnp.float32), x) + b1f
    h = jnp.maximum(h, 0.0)
    hb = h.astype(jnp.bfloat16).astype(jnp.float32)
    logits = jnp.einsum('oc,bcn->bon', w2b.astype(jnp.float32), hb) + b2c
    out = jax.nn.log_softmax(logits, axis=1)
    return jnp.transpose(out, (0, 2, 1))


if __name__ == "__main__":
    key = jax.random.PRNGKey(0)
    ks = iter(jax.random.split(key, 16))

    B, N, C_in = 2, 1024, 3

    # Module-level inputs per the PyTorch forward signature.
    xyz = jax.random.normal(next(ks), (B, C_in, N), jnp.float32)
    cls_label = jax.nn.one_hot(jnp.zeros((B,), jnp.int32), 16, dtype=jnp.float32)

    # TODO(synk): FPAC and PointNetFeaturePropagation_backup are not defined in
    # the provided source; l0_points (fp1 output, (B, 128, N)) and f3 (fpac3
    # global feature) are synthesized deterministically instead of computed.
    l0_points = jax.random.normal(next(ks), (B, HIDDEN, N), jnp.float32)
    f3 = jax.random.normal(next(ks), (B, 1024, 1), jnp.float32)

    # Deterministic head parameters (channel-major, as in nn.Conv1d / nn.BatchNorm1d),
    # with non-trivial BN statistics so the folding path is exercised.
    w1 = jax.random.normal(next(ks), (HIDDEN, HIDDEN), jnp.float32) * 0.05        # conv1 weight
    b1 = jax.random.normal(next(ks), (HIDDEN,), jnp.float32) * 0.05
    gamma = jax.random.uniform(next(ks), (HIDDEN,), jnp.float32, 0.5, 1.5)
    beta = jax.random.normal(next(ks), (HIDDEN,), jnp.float32) * 0.1
    mean = jax.random.normal(next(ks), (HIDDEN,), jnp.float32) * 0.1
    var = jax.random.uniform(next(ks), (HIDDEN,), jnp.float32, 0.5, 1.5)
    w2 = jax.random.normal(next(ks), (NUM_CLASSES, HIDDEN), jnp.float32) * 0.05    # conv2 weight
    b2 = jax.random.normal(next(ks), (NUM_CLASSES,), jnp.float32) * 0.05
    params = (w1, b1, gamma, beta, mean, var, w2, b2)

    prepared = prepare_head_params(params)

    head = jax.jit(seg_head)
    x_out = head(l0_points, prepared)            # (B, N, num_classes) log-probs
    jax.block_until_ready(x_out)

    # Sanity check against a plain-JAX reference of the same (folded, bf16-input) head.
    ref = reference_head(l0_points, prepared)
    assert x_out.shape == (B, N, NUM_CLASSES)
    assert jnp.allclose(x_out, ref, atol=2e-3, rtol=2e-3), "mismatch vs reference"
    assert jnp.isfinite(x_out).all(), "non-finite log-probs"

    _ = (x_out, f3)   # forward returns (log-probs, f3)
    print("KERNEL_OK")
</pallas_src>

<mosaic_0001>
module attributes {stable_mosaic.version = 11 : i64} {
  func.func @seg_head_kernel(%arg0: i32, %arg1: i32, %arg2: memref<1x128x512xf32, #tpu.memory_space<vmem>>, %arg3: memref<128x128xbf16, #tpu.memory_space<vmem>>, %arg4: memref<128x1xf32, #tpu.memory_space<vmem>>, %arg5: memref<16x128xbf16, #tpu.memory_space<vmem>>, %arg6: memref<16x1xf32, #tpu.memory_space<vmem>>, %arg7: memref<1x16x512xf32, #tpu.memory_space<vmem>>) attributes {dimension_semantics = [#tpu.dimension_semantics<parallel>, #tpu.dimension_semantics<parallel>], iteration_bounds = array<i64: 2, 2>, scalar_prefetch = 0 : i64, scratch_operands = 0 : i64, tpu.core_type = #tpu.core_type<tc>, window_params = [{transform_indices = @transform_0, window_bounds = array<i64: 1, 128, 512>}, {pipeline_mode = #tpu.pipeline_mode<synchronous>, transform_indices = @transform_1, window_bounds = array<i64: 128, 128>}, {pipeline_mode = #tpu.pipeline_mode<synchronous>, transform_indices = @transform_2, window_bounds = array<i64: 128, 1>}, {pipeline_mode = #tpu.pipeline_mode<synchronous>, transform_indices = @transform_3, window_bounds = array<i64: 16, 128>}, {pipeline_mode = #tpu.pipeline_mode<synchronous>, transform_indices = @transform_4, window_bounds = array<i64: 16, 1>}, {transform_indices = @transform_5, window_bounds = array<i64: 1, 16, 512>}]} {
    %c0 = arith.constant 0 : index
    %c0_0 = arith.constant 0 : index
    %c0_1 = arith.constant 0 : index
    %0 = vector.load %arg2[%c0, %c0_0, %c0_1] : memref<1x128x512xf32, #tpu.memory_space<vmem>>, vector<1x128x512xf32>
    %1 = vector.shape_cast %0 : vector<1x128x512xf32> to vector<128x512xf32>
    %2 = arith.truncf %1 : vector<128x512xf32> to vector<128x512xbf16>
    %c0_2 = arith.constant 0 : index
    %c0_3 = arith.constant 0 : index
    %3 = vector.load %arg3[%c0_2, %c0_3] : memref<128x128xbf16, #tpu.memory_space<vmem>>, vector<128x128xbf16>
    %cst = arith.constant dense<0.000000e+00> : vector<128x512xf32>
    %4 = tpu.matmul %3, %2, %cst {dimension_numbers = #tpu.dot_dimension_numbers<[1], [0], [0], [1], [0, 0, 1, 1], [], []>} : vector<128x128xbf16>, vector<128x512xbf16>, vector<128x512xf32> -> vector<128x512xf32>
    %c0_4 = arith.constant 0 : index
    %c0_5 = arith.constant 0 : index
    %5 = vector.load %arg4[%c0_4, %c0_5] : memref<128x1xf32, #tpu.memory_space<vmem>>, vector<128x1xf32>
    %6 = vector.broadcast %5 : vector<128x1xf32> to vector<128x512xf32>
    %7 = arith.addf %4, %6 : vector<128x512xf32>
    %cst_6 = arith.constant 0.000000e+00 : f32
    %8 = vector.broadcast %cst_6 : f32 to vector<128x512xf32>
    %9 = arith.maximumf %7, %8 : vector<128x512xf32>
    %c0_7 = arith.constant 0 : index
    %c0_8 = arith.constant 0 : index
    %10 = vector.load %arg5[%c0_7, %c0_8] : memref<16x128xbf16, #tpu.memory_space<vmem>>, vector<16x128xbf16>
    %11 = arith.truncf %9 : vector<128x512xf32> to vector<128x512xbf16>
    %cst_9 = arith.constant dense<0.000000e+00> : vector<16x512xf32>
    %12 = tpu.matmul %10, %11, %cst_9 {dimension_numbers = #tpu.dot_dimension_numbers<[1], [0], [0], [1], [0, 0, 1, 1], [], []>} : vector<16x128xbf16>, vector<128x512xbf16>, vector<16x512xf32> -> vector<16x512xf32>
    %c0_10 = arith.constant 0 : index
    %c0_11 = arith.constant 0 : index
    %13 = vector.load %arg6[%c0_10, %c0_11] : memref<16x1xf32, #tpu.memory_space<vmem>>, vector<16x1xf32>
    %14 = vector.broadcast %13 : vector<16x1xf32> to vector<16x512xf32>
    %15 = arith.addf %12, %14 : vector<16x512xf32>
    %cst_12 = arith.constant dense<0xFF800000> : vector<512xf32>
    %16 = vector.multi_reduction <maximumf>, %15, %cst_12 [0] : vector<16x512xf32> to vector<512xf32>
    %17 = vector.shape_cast %16 : vector<512xf32> to vector<1x512xf32>
    %18 = vector.broadcast %17 : vector<1x512xf32> to vector<16x512xf32>
    %19 = arith.subf %15, %18 : vector<16x512xf32>
    %20 = math.exp %19 : vector<16x512xf32>
    %cst_13 = arith.constant dense<0.000000e+00> : vector<512xf32>
    %21 = vector.multi_reduction <add>, %20, %cst_13 [0] : vector<16x512xf32> to vector<512xf32>
    %22 = vector.shape_cast %21 : vector<512xf32> to vector<1x512xf32>
    %23 = math.log %22 : vector<1x512xf32>
    %24 = arith.addf %23, %17 : vector<1x512xf32>
    %25 = vector.broadcast %24 : vector<1x512xf32> to vector<16x512xf32>
    %26 = arith.subf %15, %25 : vector<16x512xf32>
    %c0_14 = arith.constant 0 : index
    %c0_15 = arith.constant 0 : index
    %c0_16 = arith.constant 0 : index
    %27 = vector.load %arg7[%c0_14, %c0_15, %c0_16] : memref<1x16x512xf32, #tpu.memory_space<vmem>>, vector<1x16x512xf32>
    %28 = vector.shape_cast %27 : vector<1x16x512xf32> to vector<16x512xf32>
    %29 = vector.shape_cast %26 : vector<16x512xf32> to vector<1x16x512xf32>
    tpu.vector_store %arg7[%c0_14, %c0_15, %c0_16], %29 {strides = array<i32>} : memref<1x16x512xf32, #tpu.memory_space<vmem>>, vector<1x16x512xf32>,
    return
  }
  func.func @transform_0(%arg0: i32, %arg1: i32) -> (i32, i32, i32) {
    %c0_i32 = arith.constant 0 : i32
    %c0_i32_0 = arith.constant 0 : i32
    return %arg0, %c0_i32, %arg1 : i32, i32, i32
  }
  func.func @transform_1(%arg0: i32, %arg1: i32) -> (i32, i32) {
    %c0_i32 = arith.constant 0 : i32
    %c0_i32_0 = arith.constant 0 : i32
    %c0_i32_1 = arith.constant 0 : i32
    return %c0_i32, %c0_i32_0 : i32, i32
  }
  func.func @transform_2(%arg0: i32, %arg1: i32) -> (i32, i32) {
    %c0_i32 = arith.constant 0 : i32
    %c0_i32_0 = arith.constant 0 : i32
    %c0_i32_1 = arith.constant 0 : i32
    return %c0_i32, %c0_i32_0 : i32, i32
  }
  func.func @transform_3(%arg0: i32, %arg1: i32) -> (i32, i32) {
    %c0_i32 = arith.constant 0 : i32
    %c0_i32_0 = arith.constant 0 : i32
    %c0_i32_1 = arith.constant 0 : i32
    return %c0_i32, %c0_i32_0 : i32, i32
  }
  func.func @transform_4(%arg0: i32, %arg1: i32) -> (i32, i32) {
    %c0_i32 = arith.constant 0 : i32
    %c0_i32_0 = arith.constant 0 : i32
    %c0_i32_1 = arith.constant 0 : i32
    return %c0_i32, %c0_i32_0 : i32, i32
  }
  func.func @transform_5(%arg0: i32, %arg1: i32) -> (i32, i32, i32) {
    %c0_i32 = arith.constant 0 : i32
    %c0_i32_0 = arith.constant 0 : i32
    return %arg0, %c0_i32, %arg1 : i32, i32, i32
  }
}

</mosaic_0001>

<bundles_post_ra>
// kernel: seg_head.1
= control target key start
LH: loop header
LB: loop body
LE: loop exit
PB: predicated region body
PF: predicated region fallthrough
CT: control target
= control target key end

     0   :  { %10 = vsyncpa [#allocation3], 0  ;;  %s1902_s0 = inlined_call_operand.hbm [shape: f32[2,128,1024], index: 0, kind: input, shape index: {}]   ;;  %s1903_s1 = inlined_call_operand.vmem [shape: bf16[128,128], index: 1, kind: input, shape index: {}]   ;;  %s1904_s2 = inlined_call_operand.vmem [shape: f32[128,1], index: 2, kind: input, shape index: {}]   ;;  %s1905_s3 = inlined_call_operand.vmem [shape: bf16[16,128], index: 3, kind: input, shape index: {}]   ;;  %s1906_s4 = inlined_call_operand.vmem [shape: f32[16,1], index: 4, kind: input, shape index: {}]   ;;  %s1907_s5 = inlined_call_operand.hbm [shape: f32[2,16,1024], index: 5, kind: output, shape index: {}]  }
   0x1   :  { %12 = vsyncpa [#allocation3 + $0x1], 0 }
   0x2   :  { %13 = vsyncpa [#allocation4], 0 }
   0x3   :  { %15 = vsyncpa [#allocation4 + $0x1], 0  ;;  %s1477_s18 = smov 0   ;;  %s1479_s19 = smov 0  }
   0x4   :  { %s1481_s20 = smov 0   ;;  %s1483_s21 = smov 0  }
   0x5   :  { %s1485_s22 = smov 0   ;;  %s1487_s23 = smov 0  }
   0x6   :  { %s1489_s24 = smov 0   ;;  %s1491_s25 = smov 0  }
   0x7 LB: > { %1911 = sst [smem:[#allocation8_spill]] %s1408_s18  ;;  %s1162_s26 = sadd.s32 4294967295, %s1436_s25   ;;  %s1436_s25 = sphi %s1491_s25, %s21_s25   ;;  %s1432_s24 = sphi %s1489_s24, %s1929_s24   ;;  %s1428_s23 = sphi %s1487_s23, %s1928_s23   ;;  %s1424_s22 = sphi %s1485_s22, %s1927_s22   ;;  %s1420_s21 = sphi %s1483_s21, %s1926_s21   ;;  %s1416_s20 = sphi %s1481_s20, %s1925_s20   ;;  %s1412_s19 = sphi %s1479_s19, %s1924_s19   ;;  %s1408_s18 = sphi %s1477_s18, %s1923_s18  }
   0x8   : > { %s1163_s27 = sadd.s32 4294967294, %s1436_s25   ;;  %s30_s28 = sadd.s32 1, %s1428_s23 }
   0x9   : > { %s33_s29 = sadd.s32 1, %s1432_s24  ;;  %p31_p0 = scmp.ge.s32.totalorder %s30_s28, 2 }
   0xa   : > { %s42_s30 = sadd.s32 1, %s1416_s20  ;;  %p49_p1 = scmp.ne.s32.totalorder %s1416_s20, %s1412_s19 }
   0xb   : > { %p50_p2 = scmp.eq.s32.totalorder %s1436_s25, 0  ;;  %s1931_s28 = smov (%p31_p0, %s30_s28), 0 }
   0xc   : > { %1912 = sst [smem:[#allocation9_spill]] %s1931_s28  ;;  %s1933_s29 = smov (!%p31_p0, %s33_s29), %s1432_s24 }
   0xd   : > { %s38_s6 = ssub.s32 %s1428_s23, %s1931_s28  ;;  %p1530_p3 = por %p50_p2, %p49_p1 }
   0xe   : > { %p35_p4 = scmp.ge.s32.totalorder %s1933_s29, 2  ;;  %p55_p5 = scmp.ne.s32.totalorder %s1412_s19, %s1408_s18 }
   0xf   : > { %p56_p6 = scmp.eq.s32.totalorder %s1162_s26, 0  ;;  %p165_p7 = scmp.eq.s32.totalorder %s1162_s26, 3 }
  0x10   : > { %s1935_s29 = smov (%p35_p4, %s1933_s29), 0  ;;  %p171_p10 = scmp.eq.s32.totalorder %s1163_s27, 3 }
  0x11   : > { %p1538_p8 = por %p56_p6, %p55_p5  ;;  %p1542_p9 = por %p165_p7, %p49_p1 }
  0x12   : > { %s37_s10 = ssub.s32 %s1432_s24, %s1935_s29  ;;  %p1548_p12 = por %p171_p10, %p55_p5 }
  0x13   : > { %s1915_s9 = scalar_select %p1542_p9, 1, 0 }
  0x14   : > { %s39_s11 = sor.u32 %s38_s6, %s37_s10  ;;  %p1200_p13 = scmp.lt.s32.totalorder %s1436_s25, 4 }
  0x15   : > { %p40_p11 = scmp.eq.s32.totalorder %s39_s11, 0  ;;  %s203_s13 = sand.u32 1, %s1416_s20  }
  0x16   : > { %s1916_s12 = scalar_select %p1548_p12, 1, 0 }
  0x17   : > { %s1555_s14 = scalar_select %p40_p11, %s1416_s20, %s42_s30  }
  0x18   : > { %s1166_s15 = sshll.u32 %s203_s13, 9  ;;  %s1167_s16 = sshll.u32 %s1428_s23, 2 }
  0x19   : > { %s1168_s17 = sshll.u32 %s1432_s24, 7  ;;  %s207_s26 = scalar_lea.vmem [#allocation2], %s1166_s15 }
  0x1a   : > { %s216_s28 = sshll.u32 %s207_s26, 4  ;;  %s213_s18 = sadd.s32 %s1168_s17, %s1167_s16  ;;  %s1559_s28 = int_to_ptr.vmem [resolvable:$true] %s216_s28 }
  0x1b   : > { %s1169_s27 = sshll.u32 %s213_s18, 7  ;;  %p1563_p0 = pnand %p1200_p13, %p1530_p3 }
  0x1c   : > { %s1570_s30 = scalar_lea.hbm %s1902_s0, %s1169_s27  ;;  %s1573_s15 = scalar_lea.sflag [#allocation3], %s203_s13 }
  0x1d   : > { %s1308_s18 = scalar_lea.hbm %s1570_s30, 8192  ;;  %p1310_p3 = pneg %p1563_p0 }
  0x1e   : > { %p1309_p2 = scmp.ne.s32.totalorder %s1570_s30, %s1308_s18  ;;  %s1313_s17 = scalar_lea.hbm %s1902_s0, 32768 }
  0x1f   : > { %p1314_p6 = scmp.lt.u32.totalorder %s1570_s30, %s1902_s0  ;;  %p1315_p7 = scmp.lt.u32.totalorder %s1313_s17, %s1308_s18 }
  0x20   : > { %p1311_p4 = pnand %p1310_p3, %p1309_p2  ;;  %p1317_p11 = scmp.lt.u32.totalorder %s1308_s18, %s1570_s30 }
  0x21   : > { %p1316_p10 = por %p1315_p7, %p1314_p6 }
  0x22   : > { %p1312_p5 = pneg %p1311_p4 }
  0x23   : > { %p1318_p13 = por %p1317_p11, %p1316_p10 }
  0x25   : > { %p1319_p1 = pnand %p1318_p13, %p1312_p5 }
  0x27   : > { %1322 = shalt.err (!%p1319_p1)
}
  0x28   : > { %s1323_s13 = scalar_lea.vmem %s1559_s28, 8192  ;;  %s1438_s10 = smov [#allocation2]  }
  0x29   : > { %p1324_p2 = scmp.ne.s32.totalorder %s1559_s28, %s1323_s13  ;;  %s1328_s11 = sshll.u32 %s1438_s10, 4  ;;  %s1329_s11 = int_to_ptr.vmem [resolvable:$false] %s1328_s11 }
  0x2a   : > { %s1330_s7 = scalar_lea.vmem %s1329_s11, 16384  ;;  %p1331_p9 = scmp.lt.s32.totalorder %s1559_s28, %s1329_s11 }
  0x2b   : > { %p1326_p4 = pnand %p1324_p2, %p1310_p3  ;;  %p1332_p6 = scmp.lt.s32.totalorder %s1330_s7, %s1323_s13 }
  0x2d   : > { %p1327_p12 = pneg %p1326_p4  ;;  %p1333_p7 = por %p1332_p6, %p1331_p9 }
  0x2f   : > { %p1334_p10 = pnand %p1333_p7, %p1327_p12 }
  0x31   : > { %1337 = shalt.err (!%p1334_p10)
}
  0x32   : > { %s1439_s18 = smov 1024   ;;  %s1440_s16 = smov 512  }
  0x33   : > { %s1441_s17 = smov 32   ;;  %p224_p1 = scmp.lt.s32.totalorder %s1436_s25, 5 }
  0x34   : > { %1195 = dma.hbm_to_vmem [thread:$0]  (!%p1563_p0), %s1570_s30, 8192, %s1559_s28, %s1573_s15, %s1439_s18, %s1440_s16, %s1441_s17  }
  0x35   : > { %p1918_p3 = scmp.ge.s32.totalorder %s1436_s25, 1 }
  0x37   : > { %p225_p5 = pnand %p1918_p3, %p224_p1 }
  0x38   : > { %s1605_s26 = sand.u32 (!%p225_p5), 1, %s1412_s19  }
  0x39   : > { %228 = sbr.rel (%p225_p5) target bundleno = 681 (0x2a9), region = 40  ;;  %s1171_s27 = sshll.u32 (!%p225_p5), %s1605_s26, 9 }
  0x3a   : > { %s231_s13 = scalar_lea.sflag (!%p225_p5), [#allocation3], %s1605_s26  ;;  %s1609_s10 = scalar_lea.vmem (!%p225_p5), [#allocation2], %s1171_s27 }
  0x40   : > { %1399 = dma.done.wait (%p1538_p8), %s231_s13, 8192  }
  0x41   : > { %1401 = vsyncadd (%p1538_p8), %s231_s13, 4294959104  ;;  %v1442_v0 = vmov 0   ;;  %v265_v1 = vld [vmem:[%s1609_s10 + $0x8] sm:$0xff]  ;;  %v267_v3 = vld [vmem:[%s1609_s10 + $0x18] sm:$0xff]  ;;  %s1172_s6 = sshll.u32 %s1605_s26, 6  ;;  %s1183_s30 = sshll.u32 %s1420_s21, 2 }
  0x42   : > { %552 = vmatprep.mubr.bf16.mxu0 %v1442_v0  ;;  %665 = vmatprep.mubr.bf16.mxu1 %v1442_v0  ;;  %v269_v2 = vld [vmem:[%s1609_s10 + $0x28] sm:$0xff]  ;;  %v271_v5 = vld [vmem:[%s1609_s10 + $0x38] sm:$0xff]  ;;  %v264_v6 = vld [vmem:[%s1609_s10] sm:$0xff]  ;;  %s1184_s15 = sshll.u32 %s1424_s22, 4  ;;  %s260_s7 = scalar_lea.vmem [#allocation5], %s1172_s6 }
  0x43   : > { %1273 = vset.pattern.permute.xlu0 %v1442_v0  ;;  %1274 = vset.pattern.permute.xlu1 %v1442_v0  ;;  %v329_v4 = vpack.c.bf16 %v269_v2, %v265_v1  ;;  %v268_v7 = vld [vmem:[%s1609_s10 + $0x20] sm:$0xff]  ;;  %v331_v8 = vpack.c.bf16 %v271_v5, %v267_v3  ;;  %v266_v10 = vld [vmem:[%s1609_s10 + $0x10] sm:$0xff]  ;;  %v273_v12 = vld [vmem:[%s1609_s10 + $0x48] sm:$0xff]  ;;  %s1069_s11 = sadd.s32 %s1184_s15, %s1183_s30  ;;  %s1072_s18 = sshll.u32 %s260_s7, 4  ;;  %s1838_s18 = int_to_ptr.vmem [resolvable:$true] %s1072_s18 }
  0x44   : > { %v328_v9 = vpack.c.bf16 %v268_v7, %v264_v6  ;;  %v270_v11 = vld [vmem:[%s1609_s10 + $0x30] sm:$0xff]  ;;  %v277_v14 = vld [vmem:[%s1609_s10 + $0x68] sm:$0xff]  ;;  %v275_v15 = vld [vmem:[%s1609_s10 + $0x58] sm:$0xff]  ;;  %s1185_s21 = sshll.u32 %s1069_s11, 7  ;;  %s1057_s27 = scalar_lea.sflag [#allocation4], %s1605_s26 }
  0x45   : > { %520 = vmatprep.subr.bf16.mxu0 %v329_v4  ;;  %v330_v13 = vpack.c.bf16 %v270_v11, %v266_v10  ;;  %v279_v16 = vld [vmem:[%s1609_s10 + $0x78] sm:$0xff]  ;;  %633 = vmatprep.subr.bf16.mxu1 %v331_v8  ;;  %v333_v17 = vpack.c.bf16 %v277_v14, %v273_v12  ;;  %v272_v19 = vld [vmem:[%s1609_s10 + $0x40] sm:$0xff]  ;;  %v274_v21 = vld [vmem:[%s1609_s10 + $0x50] sm:$0xff]  ;;  %s1846_s17 = scalar_lea.hbm %s1907_s5, %s1185_s21  ;;  %s1338_s13 = scalar_lea.vmem %s1838_s18, 1024 }
  0x46   : > { %521 = vmatpush1.bf16.msra.mxu0 %v328_v9  ;;  %v335_v18 = vpack.c.bf16 %v279_v16, %v275_v15  ;;  %v276_v20 = vld [vmem:[%s1609_s10 + $0x60] sm:$0xff]  ;;  %v278_v23 = vld [vmem:[%s1609_s10 + $0x70] sm:$0xff]  ;;  %v281_v24 = vld [vmem:[%s1609_s10 + $0x88] sm:$0xff]  ;;  %p1339_p8 = scmp.ne.s32.totalorder %s1838_s18, %s1338_s13  ;;  %p1919_p9 = scmp.ne.s32.totalorder %s1915_s9, 0 }
  0x47   : > { %634 = vmatpush1.bf16.msra.mxu1 %v330_v13  ;;  %v332_v22 = vpack.c.bf16 %v276_v20, %v272_v19  ;;  %v285_v25 = vld [vmem:[%s1609_s10 + $0xa8] sm:$0xff]  ;;  %522 = vmatprep.subr.bf16.mxu0 %v333_v17  ;;  %v334_v26 = vpack.c.bf16 %v278_v23, %v274_v21  ;;  %v283_v28 = vld [vmem:[%s1609_s10 + $0x98] sm:$0xff]  ;;  %v280_v30 = vld [vmem:[%s1609_s10 + $0x80] sm:$0xff] }
  0x48   : > { %635 = vmatprep.subr.bf16.mxu1 %v335_v18  ;;  %v337_v27 = vpack.c.bf16 %v285_v25, %v281_v24  ;;  %v287_v29 = vld [vmem:[%s1609_s10 + $0xb8] sm:$0xff]  ;;  %v284_v32 = vld [vmem:[%s1609_s10 + $0xa0] sm:$0xff]  ;;  %v282_v33 = vld [vmem:[%s1609_s10 + $0x90] sm:$0xff]  ;;  %p1340_p12 = pnand %p1339_p8, %p1919_p9 }
  0x49   : > { %v339_v31 = vpack.c.bf16 %v287_v29, %v283_v28  ;;  %v286_v34 = vld [vmem:[%s1609_s10 + $0xb0] sm:$0xff]  ;;  %v336_v35 = vpack.c.bf16 %v284_v32, %v280_v30  ;;  %v289_v36 = vld [vmem:[%s1609_s10 + $0xc8] sm:$0xff]  ;;  %v291_v38 = vld [vmem:[%s1609_s10 + $0xd8] sm:$0xff] }
  0x4a   : > { %523 = vmatpush1.bf16.msra.mxu0 %v332_v22  ;;  %v293_v37 = vld [vmem:[%s1609_s10 + $0xe8] sm:$0xff]  ;;  %v338_v39 = vpack.c.bf16 %v286_v34, %v282_v33  ;;  %v295_v41 = vld [vmem:[%s1609_s10 + $0xf8] sm:$0xff]  ;;  %v288_v42 = vld [vmem:[%s1609_s10 + $0xc0] sm:$0xff]  ;;  %p1341_p0 = pneg %p1340_p12 }
  0x4b   : > { %636 = vmatpush1.bf16.msra.mxu1 %v334_v26  ;;  %524 = vmatprep.subr.bf16.mxu0 %v337_v27  ;;  %v341_v40 = vpack.c.bf16 %v293_v37, %v289_v36  ;;  %v292_v43 = vld [vmem:[%s1609_s10 + $0xe0] sm:$0xff]  ;;  %v343_v44 = vpack.c.bf16 %v295_v41, %v291_v38  ;;  %v290_v45 = vld [vmem:[%s1609_s10 + $0xd0] sm:$0xff]  ;;  %v297_v47 = vld [vmem:[%s1609_s10 + $0x108] sm:$0xff] }
  0x4c   : > { %637 = vmatprep.subr.bf16.mxu1 %v339_v31  ;;  %v294_v46 = vld [vmem:[%s1609_s10 + $0xf0] sm:$0xff]  ;;  %v301_v48 = vld [vmem:[%s1609_s10 + $0x128] sm:$0xff]  ;;  %v299_v49 = vld [vmem:[%s1609_s10 + $0x118] sm:$0xff]  ;;  %v340_v51 = vpack.c.bf16 %v292_v43, %v288_v42 }
  0x4d   : > { %v303_v50 = vld [vmem:[%s1609_s10 + $0x138] sm:$0xff]  ;;  %v342_v52 = vpack.c.bf16 %v294_v46, %v290_v45  ;;  %v345_v53 = vpack.c.bf16 %v301_v48, %v297_v47  ;;  %v296_v54 = vld [vmem:[%s1609_s10 + $0x100] sm:$0xff]  ;;  %v298_v56 = vld [vmem:[%s1609_s10 + $0x110] sm:$0xff] }
  0x4e   : > { %525 = vmatpush1.bf16.msra.mxu0 %v336_v35  ;;  %v300_v55 = vld [vmem:[%s1609_s10 + $0x120] sm:$0xff]  ;;  %v347_v57 = vpack.c.bf16 %v303_v50, %v299_v49  ;;  %v302_v58 = vld [vmem:[%s1609_s10 + $0x130] sm:$0xff]  ;;  %v305_v59 = vld [vmem:[%s1609_s10 + $0x148] sm:$0xff] }
  0x4f   : > { %638 = vmatpush1.bf16.msra.mxu1 %v338_v39  ;;  %526 = vmatprep.subr.bf16.mxu0 %v341_v40  ;;  %v309_v60 = vld [vmem:[%s1609_s10 + $0x168] sm:$0xff]  ;;  %v307_v61 = vld [vmem:[%s1609_s10 + $0x158] sm:$0xff]  ;;  %v344_v63 = vpack.c.bf16 %v300_v55, %v296_v54  ;;  %v304_v1 = vld [vmem:[%s1609_s10 + $0x140] sm:$0xff]  ;;  %v346_v2 = vpack.c.bf16 %v302_v58, %v298_v56 }
  0x50   : > { %639 = vmatprep.subr.bf16.mxu1 %v343_v44  ;;  %v311_v62 = vld [vmem:[%s1609_s10 + $0x178] sm:$0xff]  ;;  %v349_v3 = vpack.c.bf16 %v309_v60, %v305_v59  ;;  %v308_v4 = vld [vmem:[%s1609_s10 + $0x160] sm:$0xff]  ;;  %v306_v5 = vld [vmem:[%s1609_s10 + $0x150] sm:$0xff] }
  0x51   : > { %v310_v6 = vld [vmem:[%s1609_s10 + $0x170] sm:$0xff]  ;;  %v351_v7 = vpack.c.bf16 %v311_v62, %v307_v61  ;;  %v313_v8 = vld [vmem:[%s1609_s10 + $0x188] sm:$0xff]  ;;  %v315_v10 = vld [vmem:[%s1609_s10 + $0x198] sm:$0xff]  ;;  %v348_v14 = vpack.c.bf16 %v308_v4, %v304_v1 }
  0x52   : > { %527 = vmatpush1.bf16.msra.mxu0 %v340_v51  ;;  %v317_v9 = vld [vmem:[%s1609_s10 + $0x1a8] sm:$0xff]  ;;  %v319_v11 = vld [vmem:[%s1609_s10 + $0x1b8] sm:$0xff]  ;;  %v312_v12 = vld [vmem:[%s1609_s10 + $0x180] sm:$0xff]  ;;  %v350_v19 = vpack.c.bf16 %v310_v6, %v306_v5 }
  0x53   : > { %640 = vmatpush1.bf16.msra.mxu1 %v342_v52  ;;  %528 = vmatprep.subr.bf16.mxu0 %v345_v53  ;;  %v316_v13 = vld [vmem:[%s1609_s10 + $0x1a0] sm:$0xff]  ;;  %v314_v15 = vld [vmem:[%s1609_s10 + $0x190] sm:$0xff]  ;;  %v321_v17 = vld [vmem:[%s1609_s10 + $0x1c8] sm:$0xff]  ;;  %v353_v20 = vpack.c.bf16 %v317_v9, %v313_v8  ;;  %v355_v22 = vpack.c.bf16 %v319_v11, %v315_v10 }
  0x54   : > { %641 = vmatprep.subr.bf16.mxu1 %v347_v57  ;;  %v318_v16 = vld [vmem:[%s1609_s10 + $0x1b0] sm:$0xff]  ;;  %v325_v18 = vld [vmem:[%s1609_s10 + $0x1e8] sm:$0xff]  ;;  %v323_v21 = vld [vmem:[%s1609_s10 + $0x1d8] sm:$0xff]  ;;  %v352_v25 = vpack.c.bf16 %v316_v13, %v312_v12 }
  0x55   : > { %v327_v23 = vld [vmem:[%s1609_s10 + $0x1f8] sm:$0xff]  ;;  %v320_v24 = vld [vmem:[%s1609_s10 + $0x1c0] sm:$0xff]  ;;  %v354_v27 = vpack.c.bf16 %v318_v16, %v314_v15  ;;  %v357_v28 = vpack.c.bf16 %v325_v18, %v321_v17  ;;  %v322_v29 = vld [vmem:[%s1609_s10 + $0x1d0] sm:$0xff] }
  0x56   : > { %529 = vmatpush1.bf16.msra.mxu0 %v344_v63  ;;  %v324_v26 = vld [vmem:[%s1609_s10 + $0x1e0] sm:$0xff]  ;;  %v359_v30 = vpack.c.bf16 %v327_v23, %v323_v21  ;;  %v326_v31 = vld [vmem:[%s1609_s10 + $0x1f0] sm:$0xff]  ;;  %v377_v37 = vld [vmem:[%s1904_s2 + $0x8] sm:$0xff]  ;;  %s1443_s10 = smov [#allocation5]  }
  0x57   : > { %642 = vmatpush1.bf16.msra.mxu1 %v346_v2  ;;  %530 = vmatprep.subr.bf16.mxu0 %v349_v3  ;;  %v356_v32 = vpack.c.bf16 %v324_v26, %v320_v24  ;;  %v376_v33 = vld [vmem:[%s1904_s2] sm:$0xff]  ;;  %v358_v34 = vpack.c.bf16 %v326_v31, %v322_v29  ;;  %v378_v35 = vld [vmem:[%s1904_s2 + $0x10] sm:$0xff]  ;;  %v379_v38 = vld [vmem:[%s1904_s2 + $0x18] sm:$0xff]  ;;  %s1342_s28 = sshll.u32 %s1443_s10, 4  ;;  %s1343_s28 = int_to_ptr.vmem [resolvable:$false] %s1342_s28 }
  0x58   : > { %643 = vmatprep.subr.bf16.mxu1 %v351_v7  ;;  %394 = vperm.xlu0 %1273, %v376_v33   ;;  %v1275_v36 = vld [vmem:[%s1903_s1] sm:$0xff]   ;;  %v381_v40 = vld [vmem:[%s1904_s2 + $0x28] sm:$0xff]  ;;  %v382_v42 = vld [vmem:[%s1904_s2 + $0x30] sm:$0xff]  ;;  %s1344_s8 = scalar_lea.vmem %s1343_s28, 2048  ;;  %p1345_p11 = scmp.lt.s32.totalorder %s1838_s18, %s1343_s28 }
  0x59   : > { %404 = vperm.xlu1 %1274, %v378_v35   ;;  %v380_v39 = vld [vmem:[%s1904_s2 + $0x20] sm:$0xff]  ;;  %v1276_v41 = vld [vmem:[%s1903_s1 + $0x8] sm:$0xff]   ;;  %v383_v43 = vld [vmem:[%s1904_s2 + $0x38] sm:$0xff]  ;;  %p1346_p13 = scmp.lt.s32.totalorder %s1344_s8, %s1338_s13 }
  0x5a   : > { %531 = vmatpush1.bf16.msra.mxu0 %v348_v14  ;;  %v384_v44 = vld [vmem:[%s1904_s2 + $0x40] sm:$0xff]  ;;  %v385_v45 = vld [vmem:[%s1904_s2 + $0x48] sm:$0xff]  ;;  %v1277_v46 = vld [vmem:[%s1903_s1 + $0x10] sm:$0xff]  }
  0x5b   : > { %644 = vmatpush1.bf16.msra.mxu1 %v350_v19  ;;  %532 = vmatprep.subr.bf16.mxu0 %v353_v20  ;;  %v386_v47 = vld [vmem:[%s1904_s2 + $0x50] sm:$0xff]  ;;  %v387_v48 = vld [vmem:[%s1904_s2 + $0x58] sm:$0xff]  ;;  %v388_v49 = vld [vmem:[%s1904_s2 + $0x60] sm:$0xff]  ;;  %p1347_p2 = por %p1346_p13, %p1345_p11 }
  0x5c   : > { %645 = vmatprep.subr.bf16.mxu1 %v355_v22  ;;  %399 = vperm.xlu0 %1273, %v377_v37   ;;  %v389_v50 = vld [vmem:[%s1904_s2 + $0x68] sm:$0xff]  ;;  %v1278_v51 = vld [vmem:[%s1903_s1 + $0x18] sm:$0xff]   ;;  %v390_v52 = vld [vmem:[%s1904_s2 + $0x70] sm:$0xff] }
  0x5d   : > { %409 = vperm.xlu1 %1274, %v379_v38   ;;  %v391_v53 = vld [vmem:[%s1904_s2 + $0x78] sm:$0xff]  ;;  %v844_v54 = vld [vmem:[%s1906_s4] sm:$0xff]  ;;  %v845_v55 = vld [vmem:[%s1906_s4 + $0x8] sm:$0xff]  ;;  %p1348_p4 = pnand %p1347_p2, %p1341_p0 }
  0x5e   : > { %533 = vmatpush1.bf16.msra.mxu0 %v352_v25  ;;  %v1279_v56 = vld [vmem:[%s1903_s1 + $0x20] sm:$0xff]   ;;  %v1280_v57 = vld [vmem:[%s1903_s1 + $0x28] sm:$0xff]   ;;  %v1281_v58 = vld [vmem:[%s1903_s1 + $0x30] sm:$0xff]  }
  0x5f   : > { %646 = vmatpush1.bf16.msra.mxu1 %v354_v27  ;;  %534 = vmatprep.subr.bf16.mxu0 %v357_v28  ;;  %v1282_v59 = vld [vmem:[%s1903_s1 + $0x38] sm:$0xff]  }
  0x60   : > { %647 = vmatprep.subr.bf16.mxu1 %v359_v30  ;;  %414 = vperm.xlu0 %1273, %v380_v39  }
  0x61   : > { %419 = vperm.xlu1 %1274, %v381_v40  }
  0x62   : > { %535 = vmatpush1.bf16.msra.mxu0 %v356_v32 }
  0x63   : > { %648 = vmatpush1.bf16.msra.mxu1 %v358_v34 }
  0x64   : > { %424 = vperm.xlu0 %1273, %v382_v42  }
  0x65   : > { %553 = vmatmul.mubr.bf16.vlgmr.msra.gmra.mrb[0].mxu0 %v1275_v36  ;;  %429 = vperm.xlu1 %1274, %v383_v43  }
  0x66   : > { %666 = vmatmul.mubr.bf16.vlgmr.msra.gmra.mrb[0].mxu1 %v1275_v36  ;;  %562 = vmatprep.mubr.bf16.mxu0 %v1442_v0 }
  0x67   : > { %675 = vmatprep.mubr.bf16.mxu1 %v1442_v0 }
  0x68   : > { %434 = vperm.xlu0 %1273, %v384_v44  }
  0x69   : > { %439 = vperm.xlu1 %1274, %v385_v45  }
  0x6c   : > { %444 = vperm.xlu0 %1273, %v386_v47  }
  0x6d   : > { %563 = vmatmul.mubr.bf16.gmra.mrb[4].mxu0 %v1276_v41  ;;  %449 = vperm.xlu1 %1274, %v387_v48  }
  0x6e   : > { %676 = vmatmul.mubr.bf16.gmra.mrb[4].mxu1 %v1276_v41  ;;  %572 = vmatprep.mubr.bf16.mxu0 %v1442_v0 }
  0x6f   : > { %685 = vmatprep.mubr.bf16.mxu1 %v1442_v0 }
  0x70   : > { %454 = vperm.xlu0 %1273, %v388_v49  }
  0x71   : > { %459 = vperm.xlu1 %1274, %v389_v50  }
  0x74   : > { %464 = vperm.xlu0 %1273, %v390_v52  }
  0x75   : > { %573 = vmatmul.mubr.bf16.gmra.mrb[8].mxu0 %v1277_v46  ;;  %469 = vperm.xlu1 %1274, %v391_v53  }
  0x76   : > { %686 = vmatmul.mubr.bf16.gmra.mrb[8].mxu1 %v1277_v46  ;;  %582 = vmatprep.mubr.bf16.mxu0 %v1442_v0 }
  0x77   : > { %695 = vmatprep.mubr.bf16.mxu1 %v1442_v0 }
  0x78   : > { %848 = vperm.xlu0 %1273, %v844_v54  }
  0x79   : > { %853 = vperm.xlu1 %1274, %v845_v55  }
  0x7d   : > { %583 = vmatmul.mubr.bf16.gmra.mrb[12].mxu0 %v1278_v51 }
  0x7e   : > { %696 = vmatmul.mubr.bf16.gmra.mrb[12].mxu1 %v1278_v51  ;;  %592 = vmatprep.mubr.bf16.mxu0 %v1442_v0 }
  0x7f   : > { %705 = vmatprep.mubr.bf16.mxu1 %v1442_v0 }
  0x85   : > { %593 = vmatmul.mubr.bf16.gmra.mrb[16].mxu0 %v1279_v56 }
  0x86   : > { %706 = vmatmul.mubr.bf16.gmra.mrb[16].mxu1 %v1279_v56  ;;  %602 = vmatprep.mubr.bf16.mxu0 %v1442_v0 }
  0x87   : > { %715 = vmatprep.mubr.bf16.mxu1 %v1442_v0 }
  0x8d   : > { %603 = vmatmul.mubr.bf16.gmra.mrb[20].mxu0 %v1280_v57 }
  0x8e   : > { %716 = vmatmul.mubr.bf16.gmra.mrb[20].mxu1 %v1280_v57  ;;  %612 = vmatprep.mubr.bf16.mxu0 %v1442_v0 }
  0x8f   : > { %725 = vmatprep.mubr.bf16.mxu1 %v1442_v0 }
  0x95   : > { %613 = vmatmul.mubr.bf16.gmra.mrb[24].mxu0 %v1281_v58 }
  0x96   : > { %726 = vmatmul.mubr.bf16.gmra.mrb[24].mxu1 %v1281_v58  ;;  %622 = vmatprep.mubr.bf16.mxu0 %v1442_v0 }
  0x97   : > { %735 = vmatprep.mubr.bf16.mxu1 %v1442_v0 }
  0x9d   : > { %623 = vmatmul.mubr.bf16.gmra.mrb[28].mxu0 %v1282_v59 }
  0x9e   : > { %736 = vmatmul.mubr.bf16.gmra.mrb[28].mxu1 %v1282_v59  ;;  %894 = vmatprep.mubr.bf16.mxu0 %v1442_v0 }
  0x9f   : > { %937 = vmatprep.mubr.bf16.mxu1 %v1442_v0 }
  0xd7   : > { %v395_v60 = vpop.permute.xlu0 %394 }
  0xd8   : > { %v405_v61 = vpop.permute.xlu1 %404 }
  0xdb   : > { %v400_v62 = vpop.permute.xlu0 %399 }
  0xdc   : > { %v410_v24 = vpop.permute.xlu1 %409 }
  0xdf   : > { %v415_v50 = vpop.permute.xlu0 %414 }
  0xe0   : > { %v420_v54 = vpop.permute.xlu1 %419 }
 0x138   : > { %v554_v63 = vpop.f32.mrb[0].mxu0 }
 0x139   : > { %v555_v1 = vadd.f32 %v554_v63, %v395_v60  ;;  %v667_v2 = vpop.f32.mrb[0].mxu1  ;;  %v556_v3 = vpop.f32.mrb[1].mxu0 }
 0x13a   : > { %v668_v4 = vadd.f32 %v667_v2, %v395_v60  ;;  %v557_v5 = vadd.f32 %v556_v3, %v395_v60  ;;  %v669_v6 = vpop.f32.mrb[1].mxu1  ;;  %v558_v7 = vpop.f32.mrb[2].mxu0 }
 0x13b   : > { %v670_v8 = vadd.f32 %v669_v6, %v395_v60  ;;  %v559_v9 = vadd.f32 %v558_v7, %v400_v62  ;;  %v671_v10 = vpop.f32.mrb[2].mxu1  ;;  %v560_v11 = vpop.f32.mrb[3].mxu0  ;;  %v746_v15 = vmax.f32 %v555_v1, 0.0 }
 0x13c   : > { %v672_v12 = vadd.f32 %v671_v10, %v400_v62  ;;  %v561_v13 = vadd.f32 %v560_v11, %v400_v62  ;;  %v673_v14 = vpop.f32.mrb[3].mxu1  ;;  %v748_v17 = vmax.f32 %v668_v4, 0.0  ;;  %v747_v18 = vmax.f32 %v557_v5, 0.0 }
 0x13d   : > { %v750_v0 = vmax.f32 %v559_v9, 0.0  ;;  %v674_v16 = vadd.f32 %v673_v14, %v400_v62  ;;  %v749_v21 = vmax.f32 %v670_v8, 0.0 }
 0x13e   : > { %v752_v19 = vmax.f32 %v672_v12, 0.0  ;;  %v751_v20 = vmax.f32 %v561_v13, 0.0 }
 0x13f   : > { %v812_v22 = vpack.c.bf16 %v750_v0, %v746_v15  ;;  %v753_v23 = vmax.f32 %v674_v16, 0.0  ;;  %v425_v16 = vpop.permute.xlu0 %424 }
 0x140   : > { %v814_v25 = vpack.c.bf16 %v752_v19, %v748_v17  ;;  %v813_v26 = vpack.c.bf16 %v751_v20, %v747_v18  ;;  %v564_v27 = vpop.f32.mrb[4].mxu0  ;;  %v430_v20 = vpop.permute.xlu1 %429 }
 0x141   : > { %v815_v28 = vpack.c.bf16 %v753_v23, %v749_v21  ;;  %v565_v29 = vadd.f32 %v564_v27, %v405_v61  ;;  %v677_v30 = vpop.f32.mrb[4].mxu1  ;;  %v566_v31 = vpop.f32.mrb[5].mxu0 }
 0x142   : > { %v678_v32 = vadd.f32 %v677_v30, %v405_v61  ;;  %v567_v33 = vadd.f32 %v566_v31, %v405_v61  ;;  %v679_v34 = vpop.f32.mrb[5].mxu1  ;;  %v568_v35 = vpop.f32.mrb[6].mxu0  ;;  %862 = vmatprep.subr.bf16.mxu0 %v813_v26 }
 0x143   : > { %v680_v36 = vadd.f32 %v679_v34, %v405_v61  ;;  %v569_v37 = vadd.f32 %v568_v35, %v410_v24  ;;  %v681_v38 = vpop.f32.mrb[6].mxu1  ;;  %905 = vmatprep.subr.bf16.mxu1 %v815_v28  ;;  %v570_v39 = vpop.f32.mrb[7].mxu0  ;;  %863 = vmatpush1.bf16.msra.mxu0 %v812_v22  ;;  %v754_v43 = vmax.f32 %v565_v29, 0.0 }
 0x144   : > { %v682_v40 = vadd.f32 %v681_v38, %v410_v24  ;;  %v571_v41 = vadd.f32 %v570_v39, %v410_v24  ;;  %v683_v42 = vpop.f32.mrb[7].mxu1  ;;  %906 = vmatpush1.bf16.msra.mxu1 %v814_v25  ;;  %v756_v46 = vmax.f32 %v678_v32, 0.0  ;;  %v755_v47 = vmax.f32 %v567_v33, 0.0 }
 0x145   : > { %v758_v44 = vmax.f32 %v569_v37, 0.0  ;;  %v684_v45 = vadd.f32 %v683_v42, %v410_v24  ;;  %v757_v51 = vmax.f32 %v680_v36, 0.0 }
 0x146   : > { %v760_v48 = vmax.f32 %v682_v40, 0.0  ;;  %v759_v49 = vmax.f32 %v571_v41, 0.0 }
 0x147   : > { %v816_v52 = vpack.c.bf16 %v758_v44, %v754_v43  ;;  %v761_v53 = vmax.f32 %v684_v45, 0.0 }
 0x148   : > { %v818_v55 = vpack.c.bf16 %v760_v48, %v756_v46  ;;  %v817_v56 = vpack.c.bf16 %v759_v49, %v755_v47  ;;  %v574_v57 = vpop.f32.mrb[8].mxu0  ;;  %v435_v46 = vpop.permute.xlu0 %434 }
 0x149   : > { %v819_v58 = vpack.c.bf16 %v761_v53, %v757_v51  ;;  %v575_v59 = vadd.f32 %v574_v57, %v415_v50  ;;  %v687_v60 = vpop.f32.mrb[8].mxu1  ;;  %v576_v61 = vpop.f32.mrb[9].mxu0 }
 0x14a   : > { %v688_v62 = vadd.f32 %v687_v60, %v415_v50  ;;  %v577_v63 = vadd.f32 %v576_v61, %v415_v50  ;;  %v689_v1 = vpop.f32.mrb[9].mxu1  ;;  %v578_v2 = vpop.f32.mrb[10].mxu0  ;;  %864 = vmatprep.subr.bf16.mxu0 %v817_v56 }
 0x14b   : > { %v690_v3 = vadd.f32 %v689_v1, %v415_v50  ;;  %v579_v4 = vadd.f32 %v578_v2, %v420_v54  ;;  %v691_v5 = vpop.f32.mrb[10].mxu1  ;;  %907 = vmatprep.subr.bf16.mxu1 %v819_v58  ;;  %v580_v6 = vpop.f32.mrb[11].mxu0  ;;  %865 = vmatpush1.bf16.msra.mxu0 %v816_v52  ;;  %v762_v10 = vmax.f32 %v575_v59, 0.0 }
 0x14c   : > { %v692_v7 = vadd.f32 %v691_v5, %v420_v54  ;;  %v581_v8 = vadd.f32 %v580_v6, %v420_v54  ;;  %v693_v9 = vpop.f32.mrb[11].mxu1  ;;  %908 = vmatpush1.bf16.msra.mxu1 %v818_v55  ;;  %v764_v13 = vmax.f32 %v688_v62, 0.0  ;;  %v763_v14 = vmax.f32 %v577_v63, 0.0  ;;  %v440_v50 = vpop.permute.xlu1 %439 }
 0x14d   : > { %v766_v11 = vmax.f32 %v579_v4, 0.0  ;;  %v694_v12 = vadd.f32 %v693_v9, %v420_v54  ;;  %v765_v17 = vmax.f32 %v690_v3, 0.0 }
 0x14e   : > { %v768_v15 = vmax.f32 %v692_v7, 0.0  ;;  %v767_v0 = vmax.f32 %v581_v8, 0.0 }
 0x14f   : > { %v820_v18 = vpack.c.bf16 %v766_v11, %v762_v10  ;;  %v769_v19 = vmax.f32 %v694_v12, 0.0 }
 0x150   : > { %v822_v21 = vpack.c.bf16 %v768_v15, %v764_v13  ;;  %v821_v22 = vpack.c.bf16 %v767_v0, %v763_v14  ;;  %v584_v23 = vpop.f32.mrb[12].mxu0  ;;  %v445_v13 = vpop.permute.xlu0 %444 }
 0x151   : > { %v823_v24 = vpack.c.bf16 %v769_v19, %v765_v17  ;;  %v585_v25 = vadd.f32 %v584_v23, %v425_v16  ;;  %v697_v26 = vpop.f32.mrb[12].mxu1  ;;  %v586_v27 = vpop.f32.mrb[13].mxu0 }
 0x152   : > { %v698_v28 = vadd.f32 %v697_v26, %v425_v16  ;;  %v587_v29 = vadd.f32 %v586_v27, %v425_v16  ;;  %v699_v30 = vpop.f32.mrb[13].mxu1  ;;  %v588_v31 = vpop.f32.mrb[14].mxu0  ;;  %866 = vmatprep.subr.bf16.mxu0 %v821_v22 }
 0x153   : > { %v700_v32 = vadd.f32 %v699_v30, %v425_v16  ;;  %v589_v33 = vadd.f32 %v588_v31, %v430_v20  ;;  %v701_v34 = vpop.f32.mrb[14].mxu1  ;;  %909 = vmatprep.subr.bf16.mxu1 %v823_v24  ;;  %v590_v35 = vpop.f32.mrb[15].mxu0  ;;  %867 = vmatpush1.bf16.msra.mxu0 %v820_v18  ;;  %v770_v39 = vmax.f32 %v585_v25, 0.0 }
 0x154   : > { %v702_v36 = vadd.f32 %v701_v34, %v430_v20  ;;  %v591_v37 = vadd.f32 %v590_v35, %v430_v20  ;;  %v703_v38 = vpop.f32.mrb[15].mxu1  ;;  %910 = vmatpush1.bf16.msra.mxu1 %v822_v21  ;;  %v772_v42 = vmax.f32 %v698_v28, 0.0  ;;  %v771_v43 = vmax.f32 %v587_v29, 0.0  ;;  %v450_v16 = vpop.permute.xlu1 %449 }
 0x155   : > { %v774_v40 = vmax.f32 %v589_v33, 0.0  ;;  %v704_v41 = vadd.f32 %v703_v38, %v430_v20  ;;  %v773_v47 = vmax.f32 %v700_v32, 0.0 }
 0x156   : > { %v776_v44 = vmax.f32 %v702_v36, 0.0  ;;  %v775_v45 = vmax.f32 %v591_v37, 0.0 }
 0x157   : > { %v824_v48 = vpack.c.bf16 %v774_v40, %v770_v39  ;;  %v777_v49 = vmax.f32 %v704_v41, 0.0 }
 0x158   : > { %v826_v51 = vpack.c.bf16 %v776_v44, %v772_v42  ;;  %v825_v52 = vpack.c.bf16 %v775_v45, %v771_v43  ;;  %v594_v53 = vpop.f32.mrb[16].mxu0  ;;  %v455_v42 = vpop.permute.xlu0 %454 }
 0x159   : > { %v827_v54 = vpack.c.bf16 %v777_v49, %v773_v47  ;;  %v595_v55 = vadd.f32 %v594_v53, %v435_v46  ;;  %v707_v56 = vpop.f32.mrb[16].mxu1  ;;  %v596_v57 = vpop.f32.mrb[17].mxu0 }
 0x15a   : > { %v708_v58 = vadd.f32 %v707_v56, %v435_v46  ;;  %v597_v59 = vadd.f32 %v596_v57, %v435_v46  ;;  %v709_v60 = vpop.f32.mrb[17].mxu1  ;;  %v598_v61 = vpop.f32.mrb[18].mxu0  ;;  %868 = vmatprep.subr.bf16.mxu0 %v825_v52 }
 0x15b   : > { %v710_v62 = vadd.f32 %v709_v60, %v435_v46  ;;  %v599_v63 = vadd.f32 %v598_v61, %v440_v50  ;;  %v711_v1 = vpop.f32.mrb[18].mxu1  ;;  %911 = vmatprep.subr.bf16.mxu1 %v827_v54  ;;  %v600_v2 = vpop.f32.mrb[19].mxu0  ;;  %869 = vmatpush1.bf16.msra.mxu0 %v824_v48  ;;  %v778_v6 = vmax.f32 %v595_v55, 0.0 }
 0x15c   : > { %v712_v3 = vadd.f32 %v711_v1, %v440_v50  ;;  %v601_v4 = vadd.f32 %v600_v2, %v440_v50  ;;  %v713_v5 = vpop.f32.mrb[19].mxu1  ;;  %912 = vmatpush1.bf16.msra.mxu1 %v826_v51  ;;  %v780_v9 = vmax.f32 %v708_v58, 0.0  ;;  %v779_v10 = vmax.f32 %v597_v59, 0.0  ;;  %v460_v46 = vpop.permute.xlu1 %459 }
 0x15d   : > { %v782_v7 = vmax.f32 %v599_v63, 0.0  ;;  %v714_v8 = vadd.f32 %v713_v5, %v440_v50  ;;  %v781_v14 = vmax.f32 %v710_v62, 0.0 }
 0x15e   : > { %v784_v11 = vmax.f32 %v712_v3, 0.0  ;;  %v783_v12 = vmax.f32 %v601_v4, 0.0 }
 0x15f   : > { %v828_v15 = vpack.c.bf16 %v782_v7, %v778_v6  ;;  %v785_v0 = vmax.f32 %v714_v8, 0.0 }
 0x160   : > { %v830_v17 = vpack.c.bf16 %v784_v11, %v780_v9  ;;  %v829_v18 = vpack.c.bf16 %v783_v12, %v779_v10  ;;  %v604_v19 = vpop.f32.mrb[20].mxu0  ;;  %v465_v9 = vpop.permute.xlu0 %464 }
 0x161   : > { %v831_v20 = vpack.c.bf16 %v785_v0, %v781_v14  ;;  %v605_v21 = vadd.f32 %v604_v19, %v445_v13  ;;  %v717_v22 = vpop.f32.mrb[20].mxu1  ;;  %v606_v23 = vpop.f32.mrb[21].mxu0 }
 0x162   : > { %v718_v24 = vadd.f32 %v717_v22, %v445_v13  ;;  %v607_v25 = vadd.f32 %v606_v23, %v445_v13  ;;  %v719_v26 = vpop.f32.mrb[21].mxu1  ;;  %v608_v27 = vpop.f32.mrb[22].mxu0  ;;  %870 = vmatprep.subr.bf16.mxu0 %v829_v18 }
 0x163   : > { %v720_v28 = vadd.f32 %v719_v26, %v445_v13  ;;  %v609_v29 = vadd.f32 %v608_v27, %v450_v16  ;;  %v721_v30 = vpop.f32.mrb[22].mxu1  ;;  %913 = vmatprep.subr.bf16.mxu1 %v831_v20  ;;  %v610_v31 = vpop.f32.mrb[23].mxu0  ;;  %871 = vmatpush1.bf16.msra.mxu0 %v828_v15  ;;  %v786_v35 = vmax.f32 %v605_v21, 0.0 }
 0x164   : > { %v722_v32 = vadd.f32 %v721_v30, %v450_v16  ;;  %v611_v33 = vadd.f32 %v610_v31, %v450_v16  ;;  %v723_v34 = vpop.f32.mrb[23].mxu1  ;;  %914 = vmatpush1.bf16.msra.mxu1 %v830_v17  ;;  %v788_v38 = vmax.f32 %v718_v24, 0.0  ;;  %v787_v39 = vmax.f32 %v607_v25, 0.0  ;;  %v470_v13 = vpop.permute.xlu1 %469 }
 0x165   : > { %v790_v36 = vmax.f32 %v609_v29, 0.0  ;;  %v724_v37 = vadd.f32 %v723_v34, %v450_v16  ;;  %v789_v43 = vmax.f32 %v720_v28, 0.0 }
 0x166   : > { %v792_v40 = vmax.f32 %v722_v32, 0.0  ;;  %v791_v41 = vmax.f32 %v611_v33, 0.0 }
 0x167   : > { %v832_v44 = vpack.c.bf16 %v790_v36, %v786_v35  ;;  %v793_v45 = vmax.f32 %v724_v37, 0.0 }
 0x168   : > { %v834_v47 = vpack.c.bf16 %v792_v40, %v788_v38  ;;  %v833_v48 = vpack.c.bf16 %v791_v41, %v787_v39  ;;  %v614_v49 = vpop.f32.mrb[24].mxu0 }
 0x169   : > { %v835_v50 = vpack.c.bf16 %v793_v45, %v789_v43  ;;  %v615_v51 = vadd.f32 %v614_v49, %v455_v42  ;;  %v727_v52 = vpop.f32.mrb[24].mxu1  ;;  %v616_v53 = vpop.f32.mrb[25].mxu0 }
 0x16a   : > { %v728_v54 = vadd.f32 %v727_v52, %v455_v42  ;;  %v617_v55 = vadd.f32 %v616_v53, %v455_v42  ;;  %v729_v56 = vpop.f32.mrb[25].mxu1  ;;  %v618_v57 = vpop.f32.mrb[26].mxu0  ;;  %872 = vmatprep.subr.bf16.mxu0 %v833_v48 }
 0x16b   : > { %v730_v58 = vadd.f32 %v729_v56, %v455_v42  ;;  %v619_v59 = vadd.f32 %v618_v57, %v460_v46  ;;  %v731_v60 = vpop.f32.mrb[26].mxu1  ;;  %915 = vmatprep.subr.bf16.mxu1 %v835_v50  ;;  %v620_v61 = vpop.f32.mrb[27].mxu0  ;;  %873 = vmatpush1.bf16.msra.mxu0 %v832_v44  ;;  %v794_v2 = vmax.f32 %v615_v51, 0.0  ;;  %v1283_v44 = vld [vmem:[%s1905_s3] sm:$0xff]  }
 0x16c   : > { %v732_v62 = vadd.f32 %v731_v60, %v460_v46  ;;  %v621_v63 = vadd.f32 %v620_v61, %v460_v46  ;;  %v733_v1 = vpop.f32.mrb[27].mxu1  ;;  %916 = vmatpush1.bf16.msra.mxu1 %v834_v47  ;;  %v796_v5 = vmax.f32 %v728_v54, 0.0  ;;  %v795_v6 = vmax.f32 %v617_v55, 0.0  ;;  %v849_v45 = vpop.permute.xlu0 %848 }
 0x16d   : > { %v798_v3 = vmax.f32 %v619_v59, 0.0  ;;  %v734_v4 = vadd.f32 %v733_v1, %v460_v46  ;;  %v797_v10 = vmax.f32 %v730_v58, 0.0  ;;  %v854_v46 = vpop.permute.xlu1 %853 }
 0x16e   : > { %v800_v7 = vmax.f32 %v732_v62, 0.0  ;;  %v799_v8 = vmax.f32 %v621_v63, 0.0 }
 0x16f   : > { %v836_v11 = vpack.c.bf16 %v798_v3, %v794_v2  ;;  %v801_v12 = vmax.f32 %v734_v4, 0.0 }
 0x170   : > { %v838_v14 = vpack.c.bf16 %v800_v7, %v796_v5  ;;  %v837_v15 = vpack.c.bf16 %v799_v8, %v795_v6  ;;  %v624_v0 = vpop.f32.mrb[28].mxu0 }
 0x171   : > { %v839_v16 = vpack.c.bf16 %v801_v12, %v797_v10  ;;  %v625_v17 = vadd.f32 %v624_v0, %v465_v9  ;;  %v737_v18 = vpop.f32.mrb[28].mxu1  ;;  %v626_v19 = vpop.f32.mrb[29].mxu0 }
 0x172   : > { %v738_v20 = vadd.f32 %v737_v18, %v465_v9  ;;  %v627_v21 = vadd.f32 %v626_v19, %v465_v9  ;;  %v739_v22 = vpop.f32.mrb[29].mxu1  ;;  %v628_v23 = vpop.f32.mrb[30].mxu0  ;;  %874 = vmatprep.subr.bf16.mxu0 %v837_v15 }
 0x173   : > { %v740_v24 = vadd.f32 %v739_v22, %v465_v9  ;;  %v629_v25 = vadd.f32 %v628_v23, %v470_v13  ;;  %v741_v26 = vpop.f32.mrb[30].mxu1  ;;  %917 = vmatprep.subr.bf16.mxu1 %v839_v16  ;;  %v630_v27 = vpop.f32.mrb[31].mxu0  ;;  %875 = vmatpush1.bf16.msra.mxu0 %v836_v11  ;;  %v802_v31 = vmax.f32 %v625_v17, 0.0 }
 0x174   : > { %v742_v28 = vadd.f32 %v741_v26, %v470_v13  ;;  %v631_v29 = vadd.f32 %v630_v27, %v470_v13  ;;  %v743_v30 = vpop.f32.mrb[31].mxu1  ;;  %918 = vmatpush1.bf16.msra.mxu1 %v838_v14  ;;  %v804_v34 = vmax.f32 %v738_v20, 0.0  ;;  %v803_v35 = vmax.f32 %v627_v21, 0.0 }
 0x175   : > { %v806_v32 = vmax.f32 %v629_v25, 0.0  ;;  %v744_v33 = vadd.f32 %v743_v30, %v470_v13  ;;  %v805_v38 = vmax.f32 %v740_v24, 0.0 }
 0x176   : > { %v808_v36 = vmax.f32 %v742_v28, 0.0  ;;  %v807_v37 = vmax.f32 %v631_v29, 0.0 }
 0x177   : > { %v840_v39 = vpack.c.bf16 %v806_v32, %v802_v31  ;;  %v809_v40 = vmax.f32 %v744_v33, 0.0 }
 0x178   : > { %v842_v41 = vpack.c.bf16 %v808_v36, %v804_v34  ;;  %v841_v42 = vpack.c.bf16 %v807_v37, %v803_v35 }
 0x179   : > { %v843_v43 = vpack.c.bf16 %v809_v40, %v805_v38 }
 0x17a   : > { %876 = vmatprep.subr.bf16.mxu0 %v841_v42 }
 0x17b   : > { %919 = vmatprep.subr.bf16.mxu1 %v843_v43  ;;  %877 = vmatpush1.bf16.msra.mxu0 %v840_v39 }
 0x17c   : > { %920 = vmatpush1.bf16.msra.mxu1 %v842_v41 }
 0x17e   : > { %895 = vmatmul.mubr.bf16.vlgmr.msra.gmra.mrb[32].mxu0 %v1283_v44 }
 0x17f   : > { %938 = vmatmul.mubr.bf16.vlgmr.msra.gmra.mrb[32].mxu1 %v1283_v44 }
 0x251   : > { %v896_v47 = vpop.f32.mrb[32].mxu0 }
 0x252   : > { %v939_v48 = vpop.f32.mrb[32].mxu1  ;;  %v898_v49 = vpop.f32.mrb[33].mxu0  ;;  %v1780_v52 = vadd.f32 %v896_v47, %v849_v45 }
 0x253   : > { %v941_v50 = vpop.f32.mrb[33].mxu1  ;;  %v900_v51 = vpop.f32.mrb[34].mxu0  ;;  %v1784_v56 = vadd.f32 %v939_v48, %v849_v45  ;;  %v1786_v57 = vadd.f32 %v898_v49, %v849_v45 }
 0x254   : > { %v1782_v53 = vadd.f32 %v900_v51, %v854_v46  ;;  %v943_v54 = vpop.f32.mrb[34].mxu1  ;;  %v902_v55 = vpop.f32.mrb[35].mxu0  ;;  %v1792_v61 = vadd.f32 %v941_v50, %v849_v45 }
 0x255   : > { %v1788_v58 = vadd.f32 %v943_v54, %v854_v46  ;;  %v1790_v59 = vadd.f32 %v902_v55, %v854_v46  ;;  %v945_v60 = vpop.f32.mrb[35].mxu1 }
 0x256   : > { %v948_v62 = vmax.f32 %v1780_v52, %v1782_v53  ;;  %v1796_v63 = vadd.f32 %v945_v60, %v854_v46 }
 0x257   : > { %v962_v1 = vmax.f32 %v1784_v56, %v1788_v58  ;;  %v955_v2 = vmax.f32 %v1786_v57, %v1790_v59 }
 0x258   : > { %v949_v3 = vrot.slane %v948_v62, 4  ;;  %v969_v4 = vmax.f32 %v1792_v61, %v1796_v63 }
 0x259   : > { %v963_v5 = vrot.slane %v962_v1, 4  ;;  %v956_v6 = vrot.slane %v955_v2, 4 }
 0x25a   : > { %v950_v7 = vmax.f32 %v948_v62, %v949_v3  ;;  %v970_v8 = vrot.slane %v969_v4, 4 }
 0x25b   : > { %v964_v9 = vmax.f32 %v962_v1, %v963_v5  ;;  %v957_v10 = vmax.f32 %v955_v2, %v956_v6 }
 0x25c   : > { %v951_v11 = vrot.slane %v950_v7, 2  ;;  %v971_v12 = vmax.f32 %v969_v4, %v970_v8 }
 0x25d   : > { %v965_v13 = vrot.slane %v964_v9, 2  ;;  %v958_v14 = vrot.slane %v957_v10, 2 }
 0x25e   : > { %v952_v15 = vmax.f32 %v950_v7, %v951_v11  ;;  %v972_v0 = vrot.slane %v971_v12, 2 }
 0x25f   : > { %v966_v16 = vmax.f32 %v964_v9, %v965_v13  ;;  %v959_v17 = vmax.f32 %v957_v10, %v958_v14 }
 0x260   : > { %v953_v18 = vrot.slane %v952_v15, 1  ;;  %v973_v19 = vmax.f32 %v971_v12, %v972_v0 }
 0x261   : > { %v967_v20 = vrot.slane %v966_v16, 1  ;;  %v960_v21 = vrot.slane %v959_v17, 1 }
 0x262   : > { %v1804_v22 = vmax.f32 %v952_v15, %v953_v18  ;;  %v974_v23 = vrot.slane %v973_v19, 1 }
 0x263   : > { %v1806_v24 = vmax.f32 %v966_v16, %v967_v20  ;;  %v1808_v25 = vmax.f32 %v959_v17, %v960_v21 }
 0x264   : > { %v976_v26 = vsub.f32 %v1780_v52, %v1804_v22  ;;  %v980_v27 = vsub.f32 %v1782_v53, %v1804_v22  ;;  %v1814_v28 = vmax.f32 %v973_v19, %v974_v23 }
 0x265   : > { %v978_v29 = vsub.f32 %v1784_v56, %v1806_v24  ;;  %v982_v30 = vsub.f32 %v1788_v58, %v1806_v24  ;;  %v977_v31 = vsub.f32 %v1786_v57, %v1808_v25  ;;  %v981_v32 = vsub.f32 %v1790_v59, %v1808_v25 }
 0x266   : > { %v984_v33 = vmul.f32 1.442695, %v976_v26  ;;  %v992_v34 = vmul.f32 1.442695, %v980_v27  ;;  %v979_v35 = vsub.f32 %v1792_v61, %v1814_v28  ;;  %v983_v36 = vsub.f32 %v1796_v63, %v1814_v28 }
 0x267   : > { %v988_v37 = vmul.f32 1.442695, %v978_v29  ;;  %v996_v38 = vmul.f32 1.442695, %v982_v30  ;;  %v986_v39 = vmul.f32 1.442695, %v977_v31 }
 0x268   : > { %1284 = vpow2.f32 %v984_v33  ;;  %v994_v40 = vmul.f32 1.442695, %v981_v32  ;;  %v990_v41 = vmul.f32 1.442695, %v979_v35  ;;  %v998_v42 = vmul.f32 1.442695, %v983_v36 }
 0x269   : > { %1286 = vpow2.f32 %v992_v34 }
 0x26a   : > { %1288 = vpow2.f32 %v988_v37 }
 0x26b   : > { %1290 = vpow2.f32 %v996_v38 }
 0x26c   : > { %1292 = vpow2.f32 %v986_v39 }
 0x26d   : > { %1294 = vpow2.f32 %v994_v40 }
 0x26e   : > { %1296 = vpow2.f32 %v990_v41 }
 0x26f   : > { %1298 = vpow2.f32 %v998_v42 }
 0x272   : > { %v1285_v43 = vpop.eup %1284 }
 0x273   : > { %v1287_v44 = vpop.eup %1286 }
 0x274   : > { %v1289_v45 = vpop.eup %1288  ;;  %v1000_v46 = vadd.f32 %v1287_v44, %v1285_v43 }
 0x275   : > { %v1291_v47 = vpop.eup %1290 }
 0x276   : > { %v1293_v48 = vpop.eup %1292  ;;  %v1001_v49 = vrot.slane %v1000_v46, 4  ;;  %v1014_v50 = vadd.f32 %v1291_v47, %v1289_v45 }
 0x277   : > { %v1295_v51 = vpop.eup %1294 }
 0x278   : > { %v1297_v54 = vpop.eup %1296  ;;  %v1002_v55 = vadd.f32 %v1001_v49, %v1000_v46  ;;  %v1015_v60 = vrot.slane %v1014_v50, 4  ;;  %v1007_v62 = vadd.f32 %v1295_v51, %v1293_v48 }
 0x279   : > { %v1299_v1 = vpop.eup %1298 }
 0x27a   : > { %v1003_v2 = vrot.slane %v1002_v55, 2  ;;  %v1016_v3 = vadd.f32 %v1015_v60, %v1014_v50  ;;  %v1008_v4 = vrot.slane %v1007_v62, 4  ;;  %v1021_v5 = vadd.f32 %v1299_v1, %v1297_v54 }
 0x27c   : > { %v1004_v6 = vadd.f32 %v1003_v2, %v1002_v55  ;;  %v1017_v7 = vrot.slane %v1016_v3, 2  ;;  %v1009_v8 = vadd.f32 %v1008_v4, %v1007_v62  ;;  %v1022_v9 = vrot.slane %v1021_v5, 4 }
 0x27e   : > { %v1005_v10 = vrot.slane %v1004_v6, 1  ;;  %v1018_v11 = vadd.f32 %v1017_v7, %v1016_v3  ;;  %v1010_v12 = vrot.slane %v1009_v8, 2  ;;  %v1023_v13 = vadd.f32 %v1022_v9, %v1021_v5 }
 0x280   : > { %v1006_v14 = vadd.f32 %v1005_v10, %v1004_v6  ;;  %v1019_v15 = vrot.slane %v1018_v11, 1  ;;  %v1011_v0 = vadd.f32 %v1010_v12, %v1009_v8  ;;  %v1024_v16 = vrot.slane %v1023_v13, 2 }
 0x282   : > { %1300 = vlog2.f32 %v1006_v14  ;;  %v1020_v17 = vadd.f32 %v1019_v15, %v1018_v11  ;;  %v1012_v18 = vrot.slane %v1011_v0, 1  ;;  %v1025_v19 = vadd.f32 %v1024_v16, %v1023_v13 }
 0x284   : > { %1302 = vlog2.f32 %v1020_v17  ;;  %v1013_v20 = vadd.f32 %v1012_v18, %v1011_v0  ;;  %v1026_v21 = vrot.slane %v1025_v19, 1 }
 0x286   : > { %1304 = vlog2.f32 %v1013_v20  ;;  %v1027_v23 = vadd.f32 %v1026_v21, %v1025_v19 }
 0x288   : > { %1306 = vlog2.f32 %v1027_v23 }
 0x28c   : > { %v1301_v26 = vpop.eup %1300 }
 0x28d   : > { %v1029_v27 = vmul.f32 0.6931472, %v1301_v26 }
 0x28e   : > { %v1303_v29 = vpop.eup %1302 }
 0x28f   : > { %v1036_v30 = vadd.f32 %v1029_v27, %v1804_v22  ;;  %v1033_v31 = vmul.f32 0.6931472, %v1303_v29 }
 0x290   : > { %v1305_v32 = vpop.eup %1304 }
 0x291   : > { %v1040_v33 = vsub.f32 %v1780_v52, %v1036_v30  ;;  %v1044_v34 = vsub.f32 %v1782_v53, %v1036_v30  ;;  %v1038_v35 = vadd.f32 %v1033_v31, %v1806_v24  ;;  %v1031_v36 = vmul.f32 0.6931472, %v1305_v32 }
 0x292   : > { %v1307_v37 = vpop.eup %1306 }
 0x293   : > { %1048 = vst [vmem:[%s260_s7] sm:$0xff] %v1040_v33  ;;  %1052 = vst [vmem:[%s260_s7 + $0x20] sm:$0xff] %v1044_v34  ;;  %v1042_v38 = vsub.f32 %v1784_v56, %v1038_v35  ;;  %v1046_v39 = vsub.f32 %v1788_v58, %v1038_v35  ;;  %v1037_v22 = vadd.f32 %v1031_v36, %v1808_v25  ;;  %v1035_v40 = vmul.f32 0.6931472, %v1307_v37 }
 0x295   : > { %1050 = vst [vmem:[%s260_s7 + $0x10] sm:$0xff] %v1042_v38  ;;  %1054 = vst [vmem:[%s260_s7 + $0x30] sm:$0xff] %v1046_v39  ;;  %v1041_v52 = vsub.f32 %v1786_v57, %v1037_v22  ;;  %v1045_v53 = vsub.f32 %v1790_v59, %v1037_v22  ;;  %v1039_v56 = vadd.f32 %v1035_v40, %v1814_v28 }
 0x297   : > { %1049 = vst [vmem:[%s260_s7 + $0x8] sm:$0xff] %v1041_v52  ;;  %1053 = vst [vmem:[%s260_s7 + $0x28] sm:$0xff] %v1045_v53  ;;  %v1043_v58 = vsub.f32 %v1792_v61, %v1039_v56  ;;  %v1047_v24 = vsub.f32 %v1796_v63, %v1039_v56 }
 0x299   : > { %1051 = vst [vmem:[%s260_s7 + $0x18] sm:$0xff] %v1043_v58  ;;  %1055 = vst [vmem:[%s260_s7 + $0x38] sm:$0xff] %v1047_v24 }
 0x29a   : > { %1351 = shalt.err (!%p1348_p4)
}
 0x29b   : > { %s1352_s6 = scalar_lea.hbm %s1846_s17, 1024  ;;  %s1356_s11 = scalar_lea.hbm %s1907_s5, 4096 }
 0x29c   : > { %p1353_p6 = scmp.ne.s32.totalorder %s1846_s17, %s1352_s6  ;;  %p1357_p1 = scmp.lt.u32.totalorder %s1846_s17, %s1907_s5 }
 0x29d   : > { %p1358_p3 = scmp.lt.u32.totalorder %s1356_s11, %s1352_s6  ;;  %p1360_p8 = scmp.lt.u32.totalorder %s1352_s6, %s1846_s17 }
 0x29e   : > { %p1354_p7 = pnand %p1353_p6, %p1919_p9 }
 0x29f   : > { %p1359_p5 = por %p1358_p3, %p1357_p1 }
 0x2a0   : > { %p1355_p10 = pneg %p1354_p7 }
 0x2a1   : > { %p1361_p12 = por %p1360_p8, %p1359_p5 }
 0x2a3   : > { %p1362_p0 = pnand %p1361_p12, %p1355_p10 }
 0x2a5   : > { %1365 = shalt.err (!%p1362_p0)
}
 0x2a6   : > { %s1444_s22 = smov 512   ;;  %s1445_s16 = smov 1024  }
 0x2a7   : > { %s1446_s13 = smov 32  }
 0x2a8   : > { %1190 = dma.vmem_to_hbm [thread:$0]  (%p1919_p9), %s1838_s18, 1024, %s1846_s17, %s1057_s27, %s1444_s22, %s1445_s16, %s1446_s13  }
 0x2a9 PF: > { %s1920_s10 = sld [smem:[#allocation8_spill]]  ;;  %p1201_p11 = scmp.ge.s32.totalorder %s1436_s25, 2 }
 0x2aa   : > { %p1921_p13 = scmp.ne.s32.totalorder %s1916_s12, 0 }
 0x2ac   : > { %p1197_p2 = pnand %p1201_p11, %p1921_p13 }
 0x2af   : > { %s1087_s28 = sand.u32 1, %s1920_s10  }
 0x2b0   : > { %s1088_s8 = scalar_lea.sflag [#allocation4], %s1087_s28 }
 0x2b1   : > { %1403 = dma.done.wait (!%p1197_p2), %s1088_s8, 1024  }
 0x2b2   : > { %1405 = vsyncadd (!%p1197_p2), %s1088_s8, 4294966272  ;;  %s21_s25 = sadd.s32 1, %s1436_s25   ;;  %s1922_s9 = sld [smem:[#allocation9_spill]] }
 0x2b3   : > { %p18_p4 = scmp.ge.s32.totalorder %s21_s25, 6   ;;  %s1923_s18 = smov %s1412_s19 }
 0x2b4   : > { %s1924_s19 = smov %s1416_s20  ;;  %s1925_s20 = smov %s1555_s14 }
 0x2b5   : > { %s1926_s21 = smov %s1428_s23  ;;  %s1927_s22 = smov %s1432_s24 }
 0x2b6   : > { %s1929_s24 = smov %s1935_s29  ;;  %20 = sbr.rel (!%p18_p4) target bundleno = 7 (0x7), region = 85 }
 0x2b8   : > { %s1928_s23 = smov %s1922_s9 }
 0x2bd   :  { %1093 = vsyncpa [#allocation3], 1 }
 0x2be   :  { %1095 = vsyncpa [#allocation3 + $0x1], 1 }
 0x2bf   :  { %1096 = vsyncpa [#allocation4], 1 }
 0x2c0   :  { %1098 = vsyncpa [#allocation4 + $0x1], 1 }

</bundles_post_ra>
